<compile_context>
chip_gen: v5e
topology: v5e:2x2
jax: 0.10.0
libtpu: 0.0.40
codegen_flags: <defaults>
</compile_context>

<pallas_src>
import jax
import jax.numpy as jnp
from jax.experimental import pallas as pl
from jax.experimental.pallas import tpu as pltpu

PRETRAINED_VECTOR_SIZE = 16
LANE = 128


def _round_up(n, m):
    return ((n + m - 1) // m) * m


def _pad_to(x, shape):
    pads = [(0, t - s) for s, t in zip(x.shape, shape)]
    return jnp.pad(x, pads)


def _head_kernel(x_ref, w1_ref, w2_ref, w3_ref, b_ref, o_ref):
    bf16 = jnp.bfloat16
    hp = w2_ref.shape[0]   # padded hidden width
    cp = w3_ref.shape[1]   # padded class width

    biases = b_ref[...]                       # (3, max(hp, cp)) f32
    b1 = biases[0:1, :hp]
    b2 = biases[1:2, :hp]
    b3 = biases[2:3, :cp]

    # fc1 + ReLU  (torch.cat fused in wrapper -> single K=128 bf16 matmul)
    h = jnp.dot(x_ref[...], w1_ref[...], preferred_element_type=jnp.float32)
    h = jnp.maximum(h + b1, 0.0)                                  # (bm, hp) f32

    # fc2 + ReLU
    h = jnp.dot(h.astype(bf16), w2_ref[...], preferred_element_type=jnp.float32)
    h = jnp.maximum(h + b2, 0.0)                                  # (bm, hp) f32

    # fc3 + Sigmoid (lane-dense (bm, cp) store)
    logits = jnp.dot(h.astype(bf16), w3_ref[...], preferred_element_type=jnp.float32)
    o_ref[...] = jax.nn.sigmoid(logits + b3)


def dgl_gcn_global_head(scene_emb, goalVec, goalObjectsVec, params, n_classes,
                        block_m=None):
    """scene_emb: (B, n_hidden) f32, goalVec/goalObjectsVec: (B, PVS) f32."""
    w1, w2, w3, b = params
    B = scene_emb.shape[0]
    d_in = scene_emb.shape[1] + goalVec.shape[1] + goalObjectsVec.shape[1]
    d_in_p = w1.shape[0]
    hp = w2.shape[0]
    cp = w3.shape[1]

    # torch.cat fused once here (pad the feature axis to 128 lanes, cast to
    # bf16 so the kernel DMAs half the activation bytes and does no LHS casts).
    x = jnp.concatenate([scene_emb, goalVec, goalObjectsVec], axis=1)
    if d_in_p != d_in:
        x = jnp.pad(x, ((0, 0), (0, d_in_p - d_in)))
    x = x.astype(jnp.bfloat16)

    if block_m is None:
        block_m = min(B, 128)
    num_steps = pl.cdiv(B, block_m)   # ragged last tile handled by Pallas

    row = lambda i: (i, 0)        # batch-tiled operands
    fixed = lambda i: (0, 0)      # weights/biases: resident across the grid

    def resident(shape):
        return pl.BlockSpec(shape, fixed, pipeline_mode=pl.Buffered(1))

    # VMEM budget from actual buffers: streamed x/out double-buffered,
    # weights/biases single-buffered.
    vmem_bytes = (2 * block_m * d_in_p * 2          # x tiles (bf16)
                  + 2 * block_m * cp * 4            # out tiles (f32)
                  + (w1.size + w2.size + w3.size) * 2
                  + b.size * 4)
    vmem_limit = min(32 * 1024 * 1024, max(4 * 1024 * 1024, 2 * vmem_bytes))

    flops = 2 * B * (d_in_p * hp + hp * hp + hp * cp)
    bytes_accessed = (x.size * 2
                      + (w1.size + w2.size + w3.size) * 2
                      + b.size * 4
                      + B * cp * 4)

    out = pl.pallas_call(
        _head_kernel,
        out_shape=jax.ShapeDtypeStruct((B, cp), jnp.float32),
        grid=(num_steps,),
        in_specs=[
            pl.BlockSpec((block_m, d_in_p), row),
            resident(w1.shape),
            resident(w2.shape),
            resident(w3.shape),
            resident(b.shape),
        ],
        out_specs=pl.BlockSpec((block_m, cp), row),
        compiler_params=pltpu.CompilerParams(
            dimension_semantics=("parallel",),
            vmem_limit_bytes=vmem_limit),
        cost_estimate=pl.CostEstimate(
            flops=flops, transcendentals=B * cp,
            bytes_accessed=bytes_accessed),
    )(x, w1, w2, w3, b)

    return out[:, :n_classes]


def init_params(key, n_hidden, n_classes):
    """torch.nn.Linear-style init; weights pre-transposed to (in, out),
    zero-padded to lane width (128), stored in bf16; fc1's weight already
    holds the three concatenated input segments; biases stacked into one
    (3, max(Hp, Cp)) f32 tensor."""
    hp = _round_up(n_hidden, LANE)
    cp = _round_up(n_classes, LANE)
    d_in = n_hidden + 2 * PRETRAINED_VECTOR_SIZE
    d_in_p = _round_up(d_in, LANE)
    ks = jax.random.split(key, 6)

    def lin(kw, kb, fan_in, fan_out):
        lim = 1.0 / (fan_in ** 0.5)
        w = jax.random.uniform(kw, (fan_in, fan_out), jnp.float32, -lim, lim)
        b = jax.random.uniform(kb, (fan_out,), jnp.float32, -lim, lim)
        return w, b

    w1, b1 = lin(ks[0], ks[1], d_in, n_hidden)        # rows: scene|goal|gobj
    w2, b2 = lin(ks[2], ks[3], n_hidden, n_hidden)
    w3, b3 = lin(ks[4], ks[5], n_hidden, n_classes)

    w1p = _pad_to(w1, (d_in_p, hp)).astype(jnp.bfloat16)
    w2p = _pad_to(w2, (hp, hp)).astype(jnp.bfloat16)
    w3p = _pad_to(w3, (hp, cp)).astype(jnp.bfloat16)

    bdim = max(hp, cp)
    b = jnp.stack([_pad_to(b1, (bdim,)),
                   _pad_to(b2, (bdim,)),
                   _pad_to(b3, (bdim,))])              # (3, bdim) f32
    return (w1p, w2p, w3p, b)


def reference_forward(scene_emb, goalVec, goalObjectsVec, params, n_classes):
    """Pure-JAX reference with identical bf16-weight / f32-accumulate math."""
    w1, w2, w3, b = params
    d_in_p = w1.shape[0]
    hp = w2.shape[0]
    cp = w3.shape[1]
    x = jnp.concatenate([scene_emb, goalVec, goalObjectsVec], axis=1)
    x = jnp.pad(x, ((0, 0), (0, d_in_p - x.shape[1]))).astype(jnp.bfloat16)
    b1, b2, b3 = b[0:1, :hp], b[1:2, :hp], b[2:3, :cp]
    h = jnp.maximum(jnp.dot(x, w1, preferred_element_type=jnp.float32) + b1, 0.0)
    h = jnp.maximum(jnp.dot(h.astype(jnp.bfloat16), w2,
                            preferred_element_type=jnp.float32) + b2, 0.0)
    logits = jnp.dot(h.astype(jnp.bfloat16), w3,
                     preferred_element_type=jnp.float32) + b3
    return jax.nn.sigmoid(logits)[:, :n_classes]


if __name__ == "__main__":
    n_hidden, n_classes = 32, 8
    B = 16  # batched decoder queries

    key = jax.random.PRNGKey(0)
    k_p, k_s, k_g, k_go = jax.random.split(key, 4)

    params = init_params(k_p, n_hidden, n_classes)

    # TODO(synk): GatedHeteroRGCNLayer heterograph message passing (DGL graph
    # structure + per-edge-type gating) has no self-contained Pallas equivalent;
    # we feed the post-GCN scene embedding h[-1] directly as kernel input.
    scene_emb = jax.random.normal(k_s, (B, n_hidden), jnp.float32)
    goalVec = jax.random.normal(k_g, (B, PRETRAINED_VECTOR_SIZE), jnp.float32)
    goalObjectsVec = jax.random.normal(k_go, (B, PRETRAINED_VECTOR_SIZE), jnp.float32)

    out = dgl_gcn_global_head(scene_emb, goalVec, goalObjectsVec, params, n_classes)
    out = jax.block_until_ready(out)

    ref = reference_forward(scene_emb, goalVec, goalObjectsVec, params, n_classes)
    assert out.shape == (B, n_classes)
    assert jnp.allclose(out, ref, atol=1e-4, rtol=1e-4)

    print("KERNEL_OK")
</pallas_src>

<mosaic_0001>
module attributes {stable_mosaic.version = 11 : i64} {
  func.func @_head_kernel(%arg0: i32, %arg1: memref<16x128xbf16, #tpu.memory_space<vmem>>, %arg2: memref<128x128xbf16, #tpu.memory_space<vmem>>, %arg3: memref<128x128xbf16, #tpu.memory_space<vmem>>, %arg4: memref<128x128xbf16, #tpu.memory_space<vmem>>, %arg5: memref<3x128xf32, #tpu.memory_space<vmem>>, %arg6: memref<16x128xf32, #tpu.memory_space<vmem>>) attributes {dimension_semantics = [#tpu.dimension_semantics<parallel>], iteration_bounds = array<i64: 1>, scalar_prefetch = 0 : i64, scratch_operands = 0 : i64, tpu.core_type = #tpu.core_type<tc>, window_params = [{transform_indices = @transform_0, window_bounds = array<i64: 16, 128>}, {pipeline_mode = #tpu.pipeline_mode<synchronous>, transform_indices = @transform_1, window_bounds = array<i64: 128, 128>}, {pipeline_mode = #tpu.pipeline_mode<synchronous>, transform_indices = @transform_2, window_bounds = array<i64: 128, 128>}, {pipeline_mode = #tpu.pipeline_mode<synchronous>, transform_indices = @transform_3, window_bounds = array<i64: 128, 128>}, {pipeline_mode = #tpu.pipeline_mode<synchronous>, transform_indices = @transform_4, window_bounds = array<i64: 3, 128>}, {transform_indices = @transform_5, window_bounds = array<i64: 16, 128>}]} {
    %c0 = arith.constant 0 : index
    %c0_0 = arith.constant 0 : index
    %0 = vector.load %arg5[%c0, %c0_0] : memref<3x128xf32, #tpu.memory_space<vmem>>, vector<3x128xf32>
    %1 = vector.extract_strided_slice %0 {offsets = [0, 0], sizes = [1, 128], strides = [1, 1]} : vector<3x128xf32> to vector<1x128xf32>
    %2 = vector.extract_strided_slice %0 {offsets = [1, 0], sizes = [1, 128], strides = [1, 1]} : vector<3x128xf32> to vector<1x128xf32>
    %3 = vector.extract_strided_slice %0 {offsets = [2, 0], sizes = [1, 128], strides = [1, 1]} : vector<3x128xf32> to vector<1x128xf32>
    %c0_1 = arith.constant 0 : index
    %c0_2 = arith.constant 0 : index
    %4 = vector.load %arg1[%c0_1, %c0_2] : memref<16x128xbf16, #tpu.memory_space<vmem>>, vector<16x128xbf16>
    %c0_3 = arith.constant 0 : index
    %c0_4 = arith.constant 0 : index
    %5 = vector.load %arg2[%c0_3, %c0_4] : memref<128x128xbf16, #tpu.memory_space<vmem>>, vector<128x128xbf16>
    %cst = arith.constant dense<0.000000e+00> : vector<16x128xf32>
    %6 = tpu.matmul %4, %5, %cst {dimension_numbers = #tpu.dot_dimension_numbers<[1], [0], [0], [1], [0, 0, 1, 1], [], []>} : vector<16x128xbf16>, vector<128x128xbf16>, vector<16x128xf32> -> vector<16x128xf32>
    %7 = vector.broadcast %1 : vector<1x128xf32> to vector<16x128xf32>
    %8 = arith.addf %6, %7 : vector<16x128xf32>
    %cst_5 = arith.constant 0.000000e+00 : f32
    %9 = vector.broadcast %cst_5 : f32 to vector<16x128xf32>
    %10 = arith.maximumf %8, %9 : vector<16x128xf32>
    %11 = arith.truncf %10 : vector<16x128xf32> to vector<16x128xbf16>
    %c0_6 = arith.constant 0 : index
    %c0_7 = arith.constant 0 : index
    %12 = vector.load %arg3[%c0_6, %c0_7] : memref<128x128xbf16, #tpu.memory_space<vmem>>, vector<128x128xbf16>
    %cst_8 = arith.constant dense<0.000000e+00> : vector<16x128xf32>
    %13 = tpu.matmul %11, %12, %cst_8 {dimension_numbers = #tpu.dot_dimension_numbers<[1], [0], [0], [1], [0, 0, 1, 1], [], []>} : vector<16x128xbf16>, vector<128x128xbf16>, vector<16x128xf32> -> vector<16x128xf32>
    %14 = vector.broadcast %2 : vector<1x128xf32> to vector<16x128xf32>
    %15 = arith.addf %13, %14 : vector<16x128xf32>
    %cst_9 = arith.constant 0.000000e+00 : f32
    %16 = vector.broadcast %cst_9 : f32 to vector<16x128xf32>
    %17 = arith.maximumf %15, %16 : vector<16x128xf32>
    %18 = arith.truncf %17 : vector<16x128xf32> to vector<16x128xbf16>
    %c0_10 = arith.constant 0 : index
    %c0_11 = arith.constant 0 : index
    %19 = vector.load %arg4[%c0_10, %c0_11] : memref<128x128xbf16, #tpu.memory_space<vmem>>, vector<128x128xbf16>
    %cst_12 = arith.constant dense<0.000000e+00> : vector<16x128xf32>
    %20 = tpu.matmul %18, %19, %cst_12 {dimension_numbers = #tpu.dot_dimension_numbers<[1], [0], [0], [1], [0, 0, 1, 1], [], []>} : vector<16x128xbf16>, vector<128x128xbf16>, vector<16x128xf32> -> vector<16x128xf32>
    %21 = vector.broadcast %3 : vector<1x128xf32> to vector<16x128xf32>
    %22 = arith.addf %20, %21 : vector<16x128xf32>
    %23 = arith.negf %22 : vector<16x128xf32>
    %24 = math.exp %23 : vector<16x128xf32>
    %cst_13 = arith.constant 1.000000e+00 : f32
    %25 = vector.broadcast %cst_13 : f32 to vector<16x128xf32>
    %26 = arith.addf %25, %24 : vector<16x128xf32>
    %27 = arith.divf %25, %26 : vector<16x128xf32>
    %c0_14 = arith.constant 0 : index
    %c0_15 = arith.constant 0 : index
    %28 = vector.load %arg6[%c0_14, %c0_15] : memref<16x128xf32, #tpu.memory_space<vmem>>, vector<16x128xf32>
    tpu.vector_store %arg6[%c0_14, %c0_15], %27 {strides = array<i32>} : memref<16x128xf32, #tpu.memory_space<vmem>>, vector<16x128xf32>,
    return
  }
  func.func @transform_0(%arg0: i32) -> (i32, i32) {
    %c0_i32 = arith.constant 0 : i32
    %c0_i32_0 = arith.constant 0 : i32
    return %arg0, %c0_i32 : i32, i32
  }
  func.func @transform_1(%arg0: i32) -> (i32, i32) {
    %c0_i32 = arith.constant 0 : i32
    %c0_i32_0 = arith.constant 0 : i32
    %c0_i32_1 = arith.constant 0 : i32
    return %c0_i32, %c0_i32_0 : i32, i32
  }
  func.func @transform_2(%arg0: i32) -> (i32, i32) {
    %c0_i32 = arith.constant 0 : i32
    %c0_i32_0 = arith.constant 0 : i32
    %c0_i32_1 = arith.constant 0 : i32
    return %c0_i32, %c0_i32_0 : i32, i32
  }
  func.func @transform_3(%arg0: i32) -> (i32, i32) {
    %c0_i32 = arith.constant 0 : i32
    %c0_i32_0 = arith.constant 0 : i32
    %c0_i32_1 = arith.constant 0 : i32
    return %c0_i32, %c0_i32_0 : i32, i32
  }
  func.func @transform_4(%arg0: i32) -> (i32, i32) {
    %c0_i32 = arith.constant 0 : i32
    %c0_i32_0 = arith.constant 0 : i32
    %c0_i32_1 = arith.constant 0 : i32
    return %c0_i32, %c0_i32_0 : i32, i32
  }
  func.func @transform_5(%arg0: i32) -> (i32, i32) {
    %c0_i32 = arith.constant 0 : i32
    %c0_i32_0 = arith.constant 0 : i32
    return %arg0, %c0_i32 : i32, i32
  }
}

</mosaic_0001>

<bundles_post_ra>
// kernel: tpu_custom_call.1
= control target key start
LH: loop header
LB: loop body
LE: loop exit
PB: predicated region body
PF: predicated region fallthrough
CT: control target
= control target key end

     0   :  { %10 = vsyncpa [#allocation3], 0  ;;  %s765_s0 = inlined_call_operand.hbm [shape: bf16[16,128], index: 0, kind: input, shape index: {}]   ;;  %s766_s1 = inlined_call_operand.hbm [shape: bf16[128,128], index: 1, kind: input, shape index: {}]   ;;  %s767_s2 = inlined_call_operand.hbm [shape: bf16[128,128], index: 2, kind: input, shape index: {}]   ;;  %s768_s3 = inlined_call_operand.hbm [shape: bf16[128,128], index: 3, kind: input, shape index: {}]   ;;  %s769_s4 = inlined_call_operand.hbm [shape: f32[3,128], index: 4, kind: input, shape index: {}]   ;;  %s770_s5 = inlined_call_operand.hbm [shape: f32[16,128], index: 5, kind: output, shape index: {}]  }
   0x1   :  { %11 = vsyncpa [#allocation6], 0 }
   0x2   :  { %12 = vsyncpa [#allocation9], 0 }
   0x3   :  { %13 = vsyncpa [#allocation4], 0  ;;  %s31_s20 = sshll.u32 %s766_s1, 4  ;;  %s707_s21 = smov [#allocation5]   ;;  %s32_s20 = int_to_ptr.hbm [resolvable:$true] %s31_s20 }
   0x4   :  { %s33_s22 = sshll.u32 %s707_s21, 4  ;;  %s57_s25 = sshll.u32 %s768_s3, 4  ;;  %s34_s22 = int_to_ptr.vmem [resolvable:$true] %s33_s22  ;;  %s58_s25 = int_to_ptr.hbm [resolvable:$true] %s57_s25 }
   0x5   :  { %s708_s26 = smov 64   ;;  %s709_s27 = smov 4  }
   0x6   :  { %39 = dma.hbm_to_vmem [thread:$0]  %s32_s20, 1024, %s34_s22, [#allocation6], %s708_s26, %s708_s26, %s709_s27  }
   0x7   :  { %s710_s28 = smov [#allocation8]   ;;  %s18_s7 = sshll.u32 %s765_s0, 4  ;;  %s19_s7 = int_to_ptr.hbm [resolvable:$true] %s18_s7 }
   0x8   :  { %s59_s29 = sshll.u32 %s710_s28, 4  ;;  %s44_s9 = sshll.u32 %s767_s2, 4  ;;  %s60_s29 = int_to_ptr.vmem [resolvable:$true] %s59_s29  ;;  %s45_s9 = int_to_ptr.hbm [resolvable:$true] %s44_s9 }
   0x9   :  { %65 = dma.hbm_to_vmem [thread:$0]  %s58_s25, 1024, %s60_s29, [#allocation9], %s708_s26, %s708_s26, %s709_s27  }
   0xa   :  { %s711_s10 = smov [#allocation2]   ;;  %s712_s3 = smov [#allocation7]  }
   0xb   :  { %s20_s11 = sshll.u32 %s711_s10, 4  ;;  %s46_s12 = sshll.u32 %s712_s3, 4  ;;  %s21_s11 = int_to_ptr.vmem [resolvable:$true] %s20_s11  ;;  %s47_s12 = int_to_ptr.vmem [resolvable:$true] %s46_s12 }
   0xc   :  { %26 = dma.hbm_to_vmem [thread:$0]  %s19_s7, 128, %s21_s11, [#allocation3], %s708_s26, %s708_s26, %s709_s27  }
   0xd   :  { %s71_s15 = sshll.u32 %s769_s4, 4  ;;  %s713_s0 = smov [#allocation10]   ;;  %s72_s15 = int_to_ptr.hbm [resolvable:$true] %s71_s15 }
   0xe   :  { %52 = dma.hbm_to_vmem [thread:$0]  %s45_s9, 1024, %s47_s12, [#allocation6], %s708_s26, %s708_s26, %s709_s27  }
   0xf   :  { %s73_s16 = sshll.u32 %s713_s0, 4  ;;  %s74_s16 = int_to_ptr.vmem [resolvable:$true] %s73_s16 }
  0x10   :  { %76 = dma.hbm_to_vmem [thread:$0]  %s72_s15, 64, %s74_s16, [#allocation9]  }
  0x11   :  { %699 = dma.done.wait [#allocation3], 128  }
  0x12   :  { %700 = vsyncadd [#allocation3], 4294967168 }
  0x13   :  { %701 = dma.done.wait [#allocation6], 2048  }
  0x14   :  { %702 = vsyncadd [#allocation6], 4294965248 }
  0x15   :  { %703 = dma.done.wait [#allocation9], 1088  }
  0x16   :  { %704 = vsyncadd [#allocation9], 4294966208  ;;  %v520_v0 = vld [vmem:[#allocation5 + $0x38] sm:$0xff]  ;;  %v519_v1 = vld [vmem:[#allocation5 + $0x30] sm:$0xff]  ;;  %s714_s2 = smov [#allocation11]   ;;  %s395_s19 = sshll.u32 %s770_s5, 4  ;;  %s396_s19 = int_to_ptr.hbm [resolvable:$true] %s395_s19 }
  0x17   :  { %171 = vmatpush.bf16.msra.mxu0 %v520_v0  ;;  %v528_v2 = vld [vmem:[#allocation7 + $0x38] sm:$0xff]  ;;  %v527_v3 = vld [vmem:[#allocation7 + $0x30] sm:$0xff]  ;;  %v518_v4 = vld [vmem:[#allocation5 + $0x28] sm:$0xff]  ;;  %s393_s4 = sshll.u32 %s714_s2, 4  ;;  %s715_s20 = smov 128   ;;  %s394_s4 = int_to_ptr.vmem [resolvable:$true] %s393_s4 }
  0x18   :  { %253 = vmatpush.bf16.msra.mxu1 %v528_v2  ;;  %v526_v5 = vld [vmem:[#allocation7 + $0x28] sm:$0xff]  ;;  %v517_v6 = vld [vmem:[#allocation5 + $0x20] sm:$0xff]  ;;  %v516_v8 = vld [vmem:[#allocation5 + $0x18] sm:$0xff]  ;;  %s716_s21 = smov 8  }
  0x19   :  { %v525_v7 = vld [vmem:[#allocation7 + $0x20] sm:$0xff]  ;;  %v515_v9 = vld [vmem:[#allocation5 + $0x10] sm:$0xff]  ;;  %v514_v10 = vld [vmem:[#allocation5 + $0x8] sm:$0xff] }
  0x1a   :  { %v513_v11 = vld [vmem:[#allocation5] sm:$0xff]  ;;  %v512_v12 = vld [vmem:[#allocation2] sm:$0xff]  ;;  %v523_v14 = vld [vmem:[#allocation7 + $0x10] sm:$0xff] }
  0x1b   :  { %172 = vmatpush.bf16.msra.mxu0 %v519_v1  ;;  %v524_v13 = vld [vmem:[#allocation7 + $0x18] sm:$0xff]  ;;  %v522_v15 = vld [vmem:[#allocation7 + $0x8] sm:$0xff]  ;;  %v521_v16 = vld [vmem:[#allocation7] sm:$0xff] }
  0x1c   :  { %254 = vmatpush.bf16.msra.mxu1 %v527_v3  ;;  %v536_v17 = vld [vmem:[#allocation8 + $0x38] sm:$0xff]  ;;  %v535_v18 = vld [vmem:[#allocation8 + $0x30] sm:$0xff]  ;;  %v534_v19 = vld [vmem:[#allocation8 + $0x28] sm:$0xff] }
  0x1d   :  { %335 = vmatpush.bf16.msra.mxu2 %v536_v17  ;;  %v533_v20 = vld [vmem:[#allocation8 + $0x20] sm:$0xff]  ;;  %v532_v30 = vld [vmem:[#allocation8 + $0x18] sm:$0xff]  ;;  %v531_v31 = vld [vmem:[#allocation8 + $0x10] sm:$0xff] }
  0x1e   :  { %v97_v21 = vld [vmem:[#allocation10] sm:$0x7]  ;;  %v530_v32 = vld [vmem:[#allocation8 + $0x8] sm:$0xff] }
  0x1f   :  { %173 = vmatpush.bf16.msra.mxu0 %v518_v4  ;;  %v116_v23 = vperm.slane %v97_v21, 0  ;;  %v529_v33 = vld [vmem:[#allocation8] sm:$0xff]  ;;  %v204_v35 = vperm.slane %v97_v21, 1  ;;  %v286_v42 = vperm.slane %v97_v21, 2 }
  0x20   :  { %255 = vmatpush.bf16.msra.mxu1 %v526_v5 }
  0x21   :  { %336 = vmatpush.bf16.msra.mxu2 %v535_v18 }
  0x23   :  { %174 = vmatpush.bf16.msra.mxu0 %v517_v6 }
  0x24   :  { %256 = vmatpush.bf16.msra.mxu1 %v525_v7 }
  0x25   :  { %337 = vmatpush.bf16.msra.mxu2 %v534_v19 }
  0x27   :  { %175 = vmatpush.bf16.msra.mxu0 %v516_v8 }
  0x28   :  { %257 = vmatpush.bf16.msra.mxu1 %v524_v13 }
  0x29   :  { %338 = vmatpush.bf16.msra.mxu2 %v533_v20 }
  0x2b   :  { %176 = vmatpush.bf16.msra.mxu0 %v515_v9 }
  0x2c   :  { %258 = vmatpush.bf16.msra.mxu1 %v523_v14 }
  0x2d   :  { %339 = vmatpush.bf16.msra.mxu2 %v532_v30 }
  0x2f   :  { %177 = vmatpush.bf16.msra.mxu0 %v514_v10 }
  0x30   :  { %259 = vmatpush.bf16.msra.mxu1 %v522_v15 }
  0x31   :  { %340 = vmatpush.bf16.msra.mxu2 %v531_v31 }
  0x33   :  { %178 = vmatpush.bf16.msra.mxu0 %v513_v11 }
  0x34   :  { %260 = vmatpush.bf16.msra.mxu1 %v521_v16 }
  0x35   :  { %341 = vmatpush.bf16.msra.mxu2 %v530_v32 }
  0x36   :  { %179 = vmatmul.bf16.vlgmr.msra.gmra.mxu0 %v512_v12 }
  0x39   :  { %342 = vmatpush.bf16.msra.mxu2 %v529_v33 }
  0xb3   :  { %v180_v22 = vpop.f32.mrf.mxu0 }
  0xb4   :  { %v181_v24 = vadd.f32 %v180_v22, %v116_v23 }
  0xb6   :  { %v185_v27 = vmax.f32 %v181_v24, 0.0 }
  0xbb   :  { %v182_v25 = vpop.f32.mrf.mxu0 }
  0xbc   :  { %v183_v26 = vadd.f32 %v182_v25, %v116_v23 }
  0xbe   :  { %v186_v28 = vmax.f32 %v183_v26, 0.0 }
  0xc0   :  { %v187_v29 = vpack.c.bf16 %v186_v28, %v185_v27 }
  0xc2   :  { %261 = vmatmul.bf16.vlgmr.msra.gmra.mxu1 %v187_v29 }
 0x13f   :  { %v262_v34 = vpop.f32.mrf.mxu1 }
 0x140   :  { %v263_v36 = vadd.f32 %v262_v34, %v204_v35 }
 0x142   :  { %v267_v39 = vmax.f32 %v263_v36, 0.0 }
 0x147   :  { %v264_v37 = vpop.f32.mrf.mxu1 }
 0x148   :  { %v265_v38 = vadd.f32 %v264_v37, %v204_v35 }
 0x14a   :  { %v268_v40 = vmax.f32 %v265_v38, 0.0 }
 0x14c   :  { %v269_v41 = vpack.c.bf16 %v268_v40, %v267_v39 }
 0x14e   :  { %343 = vmatmul.bf16.vlgmr.msra.gmra.mxu2 %v269_v41 }
 0x1d1   :  { %v344_v43 = vpop.f32.mrf.mxu2 }
 0x1d2   :  { %v345_v44 = vadd.f32 %v344_v43, %v286_v42 }
 0x1d4   :  { %v510_v45 = vmul.f32 -1.442695, %v345_v44 }
 0x1d6   :  { %547 = vpow2.f32 %v510_v45 }
 0x1d9   :  { %v346_v46 = vpop.f32.mrf.mxu2 }
 0x1da   :  { %v347_v47 = vadd.f32 %v346_v46, %v286_v42 }
 0x1dc   :  { %v548_v48 = vpop.eup %547  ;;  %v511_v49 = vmul.f32 -1.442695, %v347_v47 }
 0x1dd   :  { %v355_v50 = vadd.f32 1.0, %v548_v48 }
 0x1de   :  { %549 = vpow2.f32 %v511_v49 }
 0x1df   :  { %551 = vrcp.f32 %v355_v50  ;;  %v368_v56 = vand.u32 2147483648, %v355_v50  ;;  %v366_v58 = vand.u32 2147483647, %v355_v50  ;;  %vm362_vm1 = vweird.f32 %v355_v50 }
 0x1e1   :  { %v369_v61 = vor.u32 1.1754944e-38, %v368_v56  ;;  %vm367_vm3 = vcmp.eq.f32.partialorder %v366_v58, 8.507059e+37 }
 0x1e4   :  { %v550_v51 = vpop.eup %549 }
 0x1e5   :  { %v552_v52 = vpop.eup %551  ;;  %v356_v53 = vadd.f32 1.0, %v550_v51 }
 0x1e6   :  { %v358_v54 = vmul.f32 %v552_v52, %v355_v50  ;;  %vm363_vm0 = vweird.f32 %v552_v52 }
 0x1e7   :  { %553 = vrcp.f32 %v356_v53  ;;  %vm364_vm2 = vmor %vm362_vm1, %vm363_vm0  ;;  %v383_v2 = vand.u32 2147483648, %v356_v53  ;;  %v381_v4 = vand.u32 2147483647, %v356_v53  ;;  %vm377_vm5 = vweird.f32 %v356_v53 }
 0x1e8   :  { %v359_v55 = vsub.f32 1.0, %v358_v54 }
 0x1e9   :  { %v384_v6 = vor.u32 1.1754944e-38, %v383_v2  ;;  %vm382_vm7 = vcmp.eq.f32.partialorder %v381_v4, 8.507059e+37 }
 0x1ea   :  { %v360_v57 = vmul.f32 %v552_v52, %v359_v55 }
 0x1ec   :  { %v361_v59 = vadd.f32 %v552_v52, %v360_v57 }
 0x1ed   :  { %v554_v60 = vpop.eup %553 }
 0x1ee   :  { %v373_v62 = vmul.f32 %v554_v60, %v356_v53  ;;  %v365_v63 = vsel %vm364_vm2, %v552_v52, %v361_v59  ;;  %vm378_vm4 = vweird.f32 %v554_v60 }
 0x1ef   :  { %v370_v0 = vsel %vm367_vm3, %v369_v61, %v365_v63  ;;  %vm379_vm6 = vmor %vm377_vm5, %vm378_vm4 }
 0x1f0   :  { %v374_v1 = vsub.f32 1.0, %v373_v62  ;;  %387 = vst [vmem:[#allocation11] sm:$0xff] %v370_v0 }
 0x1f2   :  { %v375_v3 = vmul.f32 %v554_v60, %v374_v1 }
 0x1f4   :  { %v376_v5 = vadd.f32 %v554_v60, %v375_v3 }
 0x1f6   :  { %v380_v7 = vsel %vm379_vm6, %v554_v60, %v376_v5 }
 0x1f7   :  { %v385_v8 = vsel %vm382_vm7, %v384_v6, %v380_v7 }
 0x1f8   :  { %388 = vst [vmem:[#allocation11 + $0x8] sm:$0xff] %v385_v8 }
 0x1f9   :  { %401 = dma.vmem_to_hbm [thread:$0]  %s394_s4, 256, %s396_s19, [#allocation4], %s715_s20, %s715_s20, %s716_s21  }
 0x1fa   :  { %705 = dma.done.wait [#allocation4], 256  }
 0x1fb   :  { %706 = vsyncadd [#allocation4], 4294967040 }
 0x1fc   :  { %406 = vsyncpa [#allocation3], 1 }
 0x1fd   :  { %407 = vsyncpa [#allocation6], 1 }
 0x1fe   :  { %408 = vsyncpa [#allocation9], 1 }
 0x1ff   :  { %409 = vsyncpa [#allocation4], 1 }

</bundles_post_ra>
